<compile_context>
chip_gen: v7x
topology: tpu7x:2x2x1
jax: 0.10.0
libtpu: 0.0.40
codegen_flags: <defaults>
</compile_context>

<pallas_src>
import functools
import math

import jax
import jax.numpy as jnp
from jax.experimental import pallas as pl
from jax.experimental.pallas import tpu as pltpu

_EPS = 1e-6                     # F.pairwise_distance default eps
_MAX_PACK = 16                  # bounds MXU work of the segmented-sum matmul
_TARGET_TILE_BYTES = 8 << 20    # per-input tile (native dtype), amortizes ~0.35us/step
_MAX_TILE_ROWS = 32768


def _round_up(x, m):
    return (x + m - 1) // m * m


def _vmem_capacity_bytes():
    try:
        cap = getattr(pltpu.get_tpu_info(), "vmem_capacity_bytes", None)
        if cap:
            return int(cap)
    except Exception:
        pass
    return 64 << 20             # conservative default (v7x per-TensorCore VMEM)


def _pick_pack(batch, feat):
    """Rows folded per packed row.

    Keeps pack*feat a multiple of 128 (lane-dense elementwise work), batch evenly
    divisible (so the wrapper reshape is free, no pad/copy), and pack <= _MAX_PACK
    (so the MXU segmented-sum stays cheap).  Returns 1 when packing isn't clean.
    """
    base = 128 // math.gcd(feat, 128)     # smallest pack with pack*feat % 128 == 0
    if base > _MAX_PACK or batch % base != 0:
        return 1
    pack = base
    while pack < _MAX_PACK and batch % (pack * 2) == 0:
        pack *= 2
    return pack


def _pick_tile_rows(packed_rows, packed_d, itemsize_sum, itemsize_max, vmem_budget):
    # Per packed row of VMEM: double-buffered native inputs (both embeddings) plus
    # the f32 working set inside the kernel (x1, x2 upcasts, diff, sq).
    per_row = packed_d * (2 * itemsize_sum + 4 * 4)
    cap_rows = max(8, (vmem_budget // max(per_row, 1)) // 8 * 8)
    tgt_rows = max(8, (_TARGET_TILE_BYTES // max(packed_d * itemsize_max, 1)) // 8 * 8)
    tb = min(tgt_rows, cap_rows, _MAX_TILE_ROWS, _round_up(packed_rows, 8))
    return int(max(tb, 8))


def _contrastive_loss_kernel(x1_ref, x2_ref, t_ref, part_ref, *,
                             margin, feat, pack, tile_rows, valid_rows):
    """One (packed-)batch tile.

    x1_ref, x2_ref: (tile_rows, pack*feat) packed embeddings (native dtype).
    t_ref:          (tile_rows, pack) packed targets.
    part_ref:       (1, 8, 128) f32 per-tile partial sum (lane-dense output block).
    """
    i = pl.program_id(0)
    pd = pack * feat

    # Upcast to f32 right after load (v5e VPU has no native bf16 math).
    x1 = x1_ref[...].astype(jnp.float32)
    x2 = x2_ref[...].astype(jnp.float32)

    diff = x1 - x2 + _EPS              # torch adds eps to the difference
    sq = diff * diff                   # lane-dense VPU work

    if pack == 1:
        # Fallback path (odd batch / awkward feature dim): plain in-row reduce.
        sq_dist = jnp.sum(sq, axis=-1, keepdims=True)            # (tile_rows, 1)
    else:
        # Segmented per-original-row reduce on the (otherwise idle) MXU:
        # (tile_rows, pd) @ (pd, pack) with a 0/1 segment-membership matrix.
        lane = jax.lax.broadcasted_iota(jnp.int32, (pd, pack), 0)
        col = jax.lax.broadcasted_iota(jnp.int32, (pd, pack), 1)
        seg = ((lane >= col * feat) & (lane < (col + 1) * feat)).astype(jnp.float32)
        sq_dist = jnp.dot(sq, seg,
                          precision=jax.lax.Precision.HIGHEST,
                          preferred_element_type=jnp.float32)    # (tile_rows, pack)

    dist = jnp.sqrt(sq_dist)                                     # EUP
    t = t_ref[...].astype(jnp.float32)
    hinge = jnp.maximum(margin - dist, 0.0)
    # Use sq_dist directly for the similar-pair term (== d^2, avoids sqrt^2).
    per = (1.0 - t) * sq_dist + t * (hinge * hinge)              # (tile_rows, pack)

    # Mask packed rows past the true batch.  Only emitted when the last tile is
    # actually partial (static check), so evenly tiled runs pay nothing.
    if valid_rows % tile_rows != 0:
        row = i * tile_rows + jax.lax.broadcasted_iota(jnp.int32, per.shape, 0)
        per = jnp.where(row < valid_rows, per, 0.0)

    part_ref[...] = jnp.broadcast_to(jnp.sum(per), part_ref.shape)


def contrastive_loss(output1, output2, target, margin=1.0, block_rows=None):
    """Pallas TPU implementation of ContrastiveLoss.forward.

    Args:
      output1, output2: (B, D) embeddings (any float dtype; math is done in f32).
      target:           (B,) or (B, 1) labels (0 = similar, 1 = dissimilar).
      margin:           scalar margin.
      block_rows:       optional packed-row tile override (multiple of 8), tests only.
    Returns:
      scalar float32 loss.
    """
    assert output1.shape == output2.shape and output1.ndim == 2
    B, D = output1.shape
    assert target.size == B
    target = jnp.reshape(target, (B,))

    # --- lane-dense packing: fold `pack` consecutive rows into one packed row ---
    pack = _pick_pack(B, D)
    packed_rows = B // pack
    pd = pack * D
    x1 = output1.reshape(packed_rows, pd)      # free row-major reshapes (no copy)
    x2 = output2.reshape(packed_rows, pd)
    t = target.reshape(packed_rows, pack)

    it1 = jnp.dtype(output1.dtype).itemsize
    it2 = jnp.dtype(output2.dtype).itemsize
    t_item = jnp.dtype(target.dtype).itemsize

    # VMEM budget: >=16 MiB headroom below physical VMEM (48 MiB usable on v7x),
    # and never request more than ~100 MiB (v5e/v6e have 128 MiB physical).
    vmem_allow = max(min(_vmem_capacity_bytes() - (16 << 20), 100 << 20), 24 << 20)

    if block_rows is None:
        tb = _pick_tile_rows(packed_rows, pd, it1 + it2, max(it1, it2),
                             vmem_allow - (6 << 20))
    else:
        tb = int(block_rows)
        assert tb % 8 == 0, "block_rows must be a multiple of 8"
        tb = min(tb, _round_up(packed_rows, 8))

    num_tiles = (packed_rows + tb - 1) // tb
    grid = (num_tiles,)

    est = (tb * pd * (2 * (it1 + it2) + 4 * 4)     # double-buffered native + f32 work
           + 2 * tb * pack * t_item                # target tiles
           + (4 << 20))                            # misc headroom
    vmem_limit = int(min(max(est, 32 << 20), vmem_allow))

    kernel = functools.partial(_contrastive_loss_kernel, margin=float(margin),
                               feat=D, pack=pack, tile_rows=tb,
                               valid_rows=packed_rows)

    partials = pl.pallas_call(
        kernel,
        out_shape=jax.ShapeDtypeStruct((num_tiles, 8, 128), jnp.float32),
        grid=grid,
        in_specs=[
            pl.BlockSpec((tb, pd), lambda i: (i, 0)),
            pl.BlockSpec((tb, pd), lambda i: (i, 0)),
            pl.BlockSpec((tb, pack), lambda i: (i, 0)),
        ],
        out_specs=pl.BlockSpec((1, 8, 128), lambda i: (i, 0, 0)),
        compiler_params=pltpu.CompilerParams(
            # Independent per-tile partial sums -> the batch axis can be sharded
            # across both v7x TensorCores (no effect on single-core v5e/v6e).
            dimension_semantics=("parallel",),
            vmem_limit_bytes=vmem_limit,
        ),
    )(x1, x2, t)

    # Tiny final reduction over per-tile partials (better f32 accuracy than a
    # single serial accumulator, and keeps the kernel grid fully parallel).
    return jnp.sum(partials[:, 0, 0]) / jnp.float32(B)


def _reference_loss(output1, output2, target, margin=1.0):
    # Pure-JAX reference mirroring the PyTorch code.
    d = jnp.sqrt(jnp.sum((output1.astype(jnp.float32)
                          - output2.astype(jnp.float32) + _EPS) ** 2,
                         axis=-1, keepdims=True))
    tgt = jnp.reshape(target, (-1, 1)).astype(jnp.float32)
    return jnp.mean((1.0 - tgt) * d ** 2
                    + tgt * jnp.maximum(margin - d, 0.0) ** 2)


if __name__ == "__main__":
    key = jax.random.PRNGKey(0)
    keys = jax.random.split(key, 12)

    # Case 1: f32, small D (pack=4 lane-dense path), single padded tile + mask.
    B1, D1 = 12, 32
    a1 = jax.random.normal(keys[0], (B1, D1), dtype=jnp.float32)
    b1 = jax.random.normal(keys[1], (B1, D1), dtype=jnp.float32)
    t1 = jax.random.bernoulli(keys[2], 0.5, (B1, 1)).astype(jnp.float32)
    got1 = jax.block_until_ready(contrastive_loss(a1, b1, t1, margin=1.0))
    ref1 = _reference_loss(a1, b1, t1, margin=1.0)
    assert jnp.allclose(got1, ref1, rtol=1e-4, atol=1e-5), (got1, ref1)

    # Case 2: bf16 inputs fed natively (in-kernel upcast), pack=16, margin=2.
    B2, D2 = 64, 128
    a2 = jax.random.normal(keys[3], (B2, D2), dtype=jnp.float32).astype(jnp.bfloat16)
    b2 = jax.random.normal(keys[4], (B2, D2), dtype=jnp.float32).astype(jnp.bfloat16)
    t2 = jax.random.bernoulli(keys[5], 0.5, (B2, 1)).astype(jnp.float32)
    got2 = jax.block_until_ready(contrastive_loss(a2, b2, t2, margin=2.0))
    ref2 = _reference_loss(a2, b2, t2, margin=2.0)
    assert jnp.allclose(got2, ref2, rtol=1e-4, atol=1e-4), (got2, ref2)

    # Case 3: multiple grid steps + a partial last tile (per-tile partials,
    # wrapper-side reduction, row masking).
    B3, D3 = 36, 32
    a3 = jax.random.normal(keys[6], (B3, D3), dtype=jnp.float32)
    b3 = jax.random.normal(keys[7], (B3, D3), dtype=jnp.float32)
    t3 = jax.random.bernoulli(keys[8], 0.5, (B3, 1)).astype(jnp.float32)
    got3 = jax.block_until_ready(contrastive_loss(a3, b3, t3, margin=1.0,
                                                  block_rows=8))
    ref3 = _reference_loss(a3, b3, t3, margin=1.0)
    assert jnp.allclose(got3, ref3, rtol=1e-4, atol=1e-5), (got3, ref3)

    # Case 4: odd batch -> pack=1 fallback (plain in-row reduce path), (B,) target.
    B4, D4 = 9, 32
    a4 = jax.random.normal(keys[9], (B4, D4), dtype=jnp.float32)
    b4 = jax.random.normal(keys[10], (B4, D4), dtype=jnp.float32)
    t4 = jax.random.bernoulli(keys[11], 0.5, (B4,)).astype(jnp.float32)
    got4 = jax.block_until_ready(contrastive_loss(a4, b4, t4, margin=1.0))
    ref4 = _reference_loss(a4, b4, t4, margin=1.0)
    assert jnp.allclose(got4, ref4, rtol=1e-4, atol=1e-5), (got4, ref4)

    print("KERNEL_OK")
</pallas_src>

<mosaic_0001>
module attributes {stable_mosaic.version = 11 : i64} {
  func.func @_contrastive_loss_kernel(%arg0: i32, %arg1: memref<8x128xf32, #tpu.memory_space<vmem>>, %arg2: memref<8x128xf32, #tpu.memory_space<vmem>>, %arg3: memref<8x4xf32, #tpu.memory_space<vmem>>, %arg4: memref<1x8x128xf32, #tpu.memory_space<vmem>>) attributes {dimension_semantics = [#tpu.dimension_semantics<parallel>], iteration_bounds = array<i64: 1>, scalar_prefetch = 0 : i64, scratch_operands = 0 : i64, tpu.core_type = #tpu.core_type<tc>, window_params = [{transform_indices = @transform_0, window_bounds = array<i64: 8, 128>}, {transform_indices = @transform_1, window_bounds = array<i64: 8, 128>}, {transform_indices = @transform_2, window_bounds = array<i64: 8, 4>}, {transform_indices = @transform_3, window_bounds = array<i64: 1, 8, 128>}]} {
    %c0 = arith.constant 0 : index
    %c0_0 = arith.constant 0 : index
    %0 = vector.load %arg1[%c0, %c0_0] : memref<8x128xf32, #tpu.memory_space<vmem>>, vector<8x128xf32>
    %c0_1 = arith.constant 0 : index
    %c0_2 = arith.constant 0 : index
    %1 = vector.load %arg2[%c0_1, %c0_2] : memref<8x128xf32, #tpu.memory_space<vmem>>, vector<8x128xf32>
    %2 = arith.subf %0, %1 : vector<8x128xf32>
    %cst = arith.constant 9.99999997E-7 : f32
    %3 = vector.broadcast %cst : f32 to vector<8x128xf32>
    %4 = arith.addf %2, %3 : vector<8x128xf32>
    %5 = arith.mulf %4, %4 : vector<8x128xf32>
    %6 = tpu.iota {dimensions = array<i32: 0>} : vector<128x4xi32>
    %7 = tpu.iota {dimensions = array<i32: 1>} : vector<128x4xi32>
    %c32_i32 = arith.constant 32 : i32
    %8 = vector.broadcast %c32_i32 : i32 to vector<128x4xi32>
    %9 = arith.muli %7, %8 : vector<128x4xi32>
    %10 = arith.cmpi sge, %6, %9 : vector<128x4xi32>
    %c1_i32 = arith.constant 1 : i32
    %11 = vector.broadcast %c1_i32 : i32 to vector<128x4xi32>
    %12 = arith.addi %7, %11 : vector<128x4xi32>
    %c32_i32_3 = arith.constant 32 : i32
    %13 = vector.broadcast %c32_i32_3 : i32 to vector<128x4xi32>
    %14 = arith.muli %12, %13 : vector<128x4xi32>
    %15 = arith.cmpi slt, %6, %14 : vector<128x4xi32>
    %16 = arith.andi %10, %15 : vector<128x4xi1>
    %17 = arith.extui %16 : vector<128x4xi1> to vector<128x4xi32>
    %18 = arith.sitofp %17 : vector<128x4xi32> to vector<128x4xf32>
    %cst_4 = arith.constant dense<0.000000e+00> : vector<8x4xf32>
    %19 = tpu.matmul %5, %18, %cst_4 {dimension_numbers = #tpu.dot_dimension_numbers<[1], [0], [0], [1], [0, 0, 1, 1], [], []>, precision = #tpu.contract_precision<fp32>} : vector<8x128xf32>, vector<128x4xf32>, vector<8x4xf32> -> vector<8x4xf32>
    %20 = math.sqrt %19 : vector<8x4xf32>
    %c0_5 = arith.constant 0 : index
    %c0_6 = arith.constant 0 : index
    %21 = vector.load %arg3[%c0_5, %c0_6] : memref<8x4xf32, #tpu.memory_space<vmem>>, vector<8x4xf32>
    %cst_7 = arith.constant 1.000000e+00 : f32
    %22 = vector.broadcast %cst_7 : f32 to vector<8x4xf32>
    %23 = arith.subf %22, %20 : vector<8x4xf32>
    %cst_8 = arith.constant 0.000000e+00 : f32
    %24 = vector.broadcast %cst_8 : f32 to vector<8x4xf32>
    %25 = arith.maximumf %23, %24 : vector<8x4xf32>
    %cst_9 = arith.constant 1.000000e+00 : f32
    %26 = vector.broadcast %cst_9 : f32 to vector<8x4xf32>
    %27 = arith.subf %26, %21 : vector<8x4xf32>
    %28 = arith.mulf %27, %19 : vector<8x4xf32>
    %29 = arith.mulf %25, %25 : vector<8x4xf32>
    %30 = arith.mulf %21, %29 : vector<8x4xf32>
    %31 = arith.addf %28, %30 : vector<8x4xf32>
    %c8_i32 = arith.constant 8 : i32
    %32 = arith.muli %arg0, %c8_i32 : i32
    %33 = tpu.iota {dimensions = array<i32: 0>} : vector<8x4xi32>
    %34 = vector.broadcast %32 : i32 to vector<8x4xi32>
    %35 = arith.addi %34, %33 : vector<8x4xi32>
    %c3_i32 = arith.constant 3 : i32
    %36 = vector.broadcast %c3_i32 : i32 to vector<8x4xi32>
    %37 = arith.cmpi slt, %35, %36 : vector<8x4xi32>
    %cst_10 = arith.constant 0.000000e+00 : f32
    %38 = vector.broadcast %cst_10 : f32 to vector<8x4xf32>
    %39 = arith.select %37, %31, %38 : vector<8x4xi1>, vector<8x4xf32>
    %40 = vector.shape_cast %39 : vector<8x4xf32> to vector<1x8x4xf32>
    %cst_11 = arith.constant dense<0.000000e+00> : vector<1xf32>
    %41 = vector.multi_reduction <add>, %40, %cst_11 [1, 2] : vector<1x8x4xf32> to vector<1xf32>
    %42 = vector.shape_cast %41 : vector<1xf32> to vector<1x1x1xf32>
    %43 = vector.extract %42[0, 0, 0] : f32 from vector<1x1x1xf32>
    %44 = vector.broadcast %43 : f32 to vector<1x8x128xf32>
    %c0_12 = arith.constant 0 : index
    %c0_13 = arith.constant 0 : index
    %c0_14 = arith.constant 0 : index
    %45 = vector.load %arg4[%c0_12, %c0_13, %c0_14] : memref<1x8x128xf32, #tpu.memory_space<vmem>>, vector<1x8x128xf32>
    tpu.vector_store %arg4[%c0_12, %c0_13, %c0_14], %44 {strides = array<i32>} : memref<1x8x128xf32, #tpu.memory_space<vmem>>, vector<1x8x128xf32>,
    return
  }
  func.func @transform_0(%arg0: i32) -> (i32, i32) {
    %c0_i32 = arith.constant 0 : i32
    %c0_i32_0 = arith.constant 0 : i32
    return %arg0, %c0_i32 : i32, i32
  }
  func.func @transform_1(%arg0: i32) -> (i32, i32) {
    %c0_i32 = arith.constant 0 : i32
    %c0_i32_0 = arith.constant 0 : i32
    return %arg0, %c0_i32 : i32, i32
  }
  func.func @transform_2(%arg0: i32) -> (i32, i32) {
    %c0_i32 = arith.constant 0 : i32
    %c0_i32_0 = arith.constant 0 : i32
    return %arg0, %c0_i32 : i32, i32
  }
  func.func @transform_3(%arg0: i32) -> (i32, i32, i32) {
    %c0_i32 = arith.constant 0 : i32
    %c0_i32_0 = arith.constant 0 : i32
    %c0_i32_1 = arith.constant 0 : i32
    return %arg0, %c0_i32, %c0_i32_0 : i32, i32, i32
  }
}

</mosaic_0001>

<bundles_post_ra>
// kernel: tpu_custom_call.1
= control target key start
LH: loop header
LB: loop body
LE: loop exit
PB: predicated region body
PF: predicated region fallthrough
CT: control target
= control target key end

     0   :  { %8 = vsyncpa [#allocation3], 0  ;;  %s1999_s0 = inlined_call_operand.hbm [shape: f32[3,128], index: 0, kind: input, shape index: {}]   ;;  %s2000_s1 = inlined_call_operand.hbm [shape: f32[3,128], index: 1, kind: input, shape index: {}]   ;;  %s2001_s2 = inlined_call_operand.vmem [shape: f32[3,4], index: 2, kind: input, shape index: {}]   ;;  %s2002_s3 = inlined_call_operand.hbm [shape: f32[1,8,128], index: 3, kind: output, shape index: {}]  }
   0x1   :  { %9 = vsyncpa [#allocation6], 0 }
   0x2   :  { %10 = vsyncpa [#allocation4], 0 }
   0x3   :  { %15 = vsyncadd [#allocation3], 64  ;;  %s1454_s12 = smov [#allocation2]   ;;  %s1382_s16 = scalar_lea.hbm %s1999_s0, 64 }
   0x4   :  { %s16_s13 = sshll.u32 %s1454_s12, 4  ;;  %p1383_p0 = scmp.ne.s32.totalorder %s1999_s0, %s1382_s16  ;;  %s17_s13 = int_to_ptr.vmem [resolvable:$true] %s16_s13 }
   0x5   :  { %p1386_p1 = scmp.lt.u32.totalorder %s1382_s16, %s1999_s0 }
   0x7   :  { %p1388_p2 = pnand %p1386_p1, %p1383_p0 }
   0x9   :  { %1391 = shalt.err (!%p1388_p2)
}
   0xa   :  { %s1392_s21 = scalar_lea.vmem %s17_s13, 64  ;;  %s1396_s22 = scalar_lea.vmem %s17_s13, 128 }
   0xb   :  { %p1393_p3 = scmp.ne.s32.totalorder %s17_s13, %s1392_s21  ;;  %p1397_p4 = scmp.lt.s32.totalorder %s17_s13, %s17_s13 }
   0xc   :  { %p1398_p5 = scmp.lt.s32.totalorder %s1396_s22, %s1392_s21 }
   0xe   :  { %p1399_p6 = por %p1398_p5, %p1397_p4 }
  0x10   :  { %p1400_p7 = pnand %p1399_p6, %p1393_p3 }
  0x12   :  { %1403 = shalt.err (!%p1400_p7)
}
  0x13   :  { %s1455_s23 = smov 64   ;;  %s1456_s24 = smov 4  }
  0x14   :  { %22 = dma.hbm_to_vmem [thread:$0]  %s1999_s0, 64, %s17_s13, [#allocation3], %s1455_s23, %s1455_s23, %s1456_s24  }
  0x15   :  { %27 = vsyncadd [#allocation6], 64  ;;  %s1457_s27 = smov [#allocation5]   ;;  %s1404_s4 = scalar_lea.hbm %s2000_s1, 64 }
  0x16   :  { %s28_s28 = sshll.u32 %s1457_s27, 4  ;;  %p1405_p8 = scmp.ne.s32.totalorder %s2000_s1, %s1404_s4  ;;  %s29_s28 = int_to_ptr.vmem [resolvable:$true] %s28_s28 }
  0x17   :  { %p1408_p9 = scmp.lt.u32.totalorder %s1404_s4, %s2000_s1 }
  0x19   :  { %p1410_p10 = pnand %p1408_p9, %p1405_p8 }
  0x1b   :  { %1413 = shalt.err (!%p1410_p10)
}
  0x1c   :  { %s1414_s9 = scalar_lea.vmem %s29_s28, 64  ;;  %s1418_s0 = scalar_lea.vmem %s29_s28, 128 }
  0x1d   :  { %p1415_p11 = scmp.ne.s32.totalorder %s29_s28, %s1414_s9  ;;  %p1419_p12 = scmp.lt.s32.totalorder %s29_s28, %s29_s28 }
  0x1e   :  { %p1420_p13 = scmp.lt.s32.totalorder %s1418_s0, %s1414_s9 }
  0x20   :  { %p1421_p0 = por %p1420_p13, %p1419_p12 }
  0x22   :  { %p1422_p1 = pnand %p1421_p0, %p1415_p11 }
  0x24   :  { %1425 = shalt.err (!%p1422_p1)
}
  0x25   :  { %34 = dma.hbm_to_vmem [thread:$0]  %s2000_s1, 64, %s29_s28, [#allocation6], %s1455_s23, %s1455_s23, %s1456_s24  }
  0x26   :  { %1448 = dma.done.wait [#allocation3], 128  }
  0x27   :  { %1449 = vsyncadd [#allocation3], 4294967168  ;;  %v48_v0 = vlaneseq }
  0x28   :  { %1450 = dma.done.wait [#allocation6], 128  }
  0x29   :  { %1451 = vsyncadd [#allocation6], 4294967168  ;;  %v1458_v1 = vmov 0.0|0.0   ;;  %v1509_v2 = vshrl.u32 %v48_v0, 7  ;;  %v66_v3 = vand.u32 127, %v48_v0  ;;  %vm2003_vm0 = vmmov 0  }
  0x2a   :  { %1216 = vmatprep.subr.bf16.mxu1 %v1458_v1  ;;  %1288 = vmatprep.subr.bf16.mxu0 %v1458_v1  ;;  %v1460_v4 = vmov 0.0   ;;  %v2013_v15 = vmov 0  ;;  %v1461_v17 = vmov 1.0|1.0   ;;  %v2019_v21 = vmov 0  ;;  %v43_v40 = vld [vmem:[#allocation2] sm:$0xff] }
  0x2b   :  { %1038 = vmatprep.mubr.msk.f32.mxu1 %vm2003_vm0, %v1460_v4  ;;  %1143 = vmatprep.mubr.msk.f32.mxu0 %vm2003_vm0, %v1460_v4  ;;  %v50_v5 = vadd.s32 8, %v1509_v2  ;;  %v1516_v6 = vmul.u32 32, %v66_v3  ;;  %v84_v7 = vadd.s32 1, %v66_v3  ;;  %v51_v8 = vadd.s32 16, %v1509_v2  ;;  %v44_v41 = vld [vmem:[#allocation5] sm:$0xff] }
  0x2c   :  { %v52_v10 = vadd.s32 24, %v1509_v2  ;;  %v53_v11 = vadd.s32 32, %v1509_v2  ;;  %v54_v13 = vadd.s32 40, %v1509_v2  ;;  %v55_v16 = vadd.s32 48, %v1509_v2 }
  0x2d   :  { %vm68_vm1 = vcmp.ge.s32.totalorder %v1509_v2, %v1516_v6  ;;  %v1521_v9 = vmul.u32 32, %v84_v7  ;;  %vm69_vm2 = vcmp.ge.s32.totalorder %v50_v5, %v1516_v6  ;;  %vm70_vm6 = vcmp.ge.s32.totalorder %v51_v8, %v1516_v6 }
  0x2e   :  { %vm71_vm9 = vcmp.ge.s32.totalorder %v52_v10, %v1516_v6  ;;  %vm72_vm13 = vcmp.ge.s32.totalorder %v53_v11, %v1516_v6  ;;  %v56_v19 = vadd.s32 56, %v1509_v2  ;;  %v57_v22 = vadd.s32 64, %v1509_v2 }
  0x2f   :  { %vm86_vm3 = vcmp.lt.s32.totalorder %v1509_v2, %v1521_v9  ;;  %vm87_vm4 = vcmp.lt.s32.totalorder %v50_v5, %v1521_v9  ;;  %vm88_vm7 = vcmp.lt.s32.totalorder %v51_v8, %v1521_v9  ;;  %vm89_vm10 = vcmp.lt.s32.totalorder %v52_v10, %v1521_v9 }
  0x30   :  { %vm1529_vm5 = vmand %vm68_vm1, %vm86_vm3  ;;  %vm90_vm14 = vcmp.lt.s32.totalorder %v53_v11, %v1521_v9  ;;  %vm73_vm1 = vcmp.ge.s32.totalorder %v54_v13, %v1516_v6  ;;  %v58_v24 = vadd.s32 72, %v1509_v2  ;;  %v2025_v28 = vmov 0 }
  0x31   :  { %vm1536_vm8 = vmand %vm69_vm2, %vm87_vm4  ;;  %vm91_vm2 = vcmp.lt.s32.totalorder %v54_v13, %v1521_v9  ;;  %v840_v26 = vsel %vm1529_vm5, 1.0, %v1460_v4  ;;  %v59_v29 = vadd.s32 80, %v1509_v2  ;;  %v60_v31 = vadd.s32 88, %v1509_v2 }
  0x32   :  { %vm1546_vm11 = vmpackc.low %vm1536_vm8, %vm1529_vm5  ;;  %v841_v27 = vsel %vm1536_vm8, 1.0, %v1460_v4  ;;  %vm76_vm5 = vcmp.ge.s32.totalorder %v57_v22, %v1516_v6  ;;  %vm94_vm8 = vcmp.lt.s32.totalorder %v57_v22, %v1521_v9  ;;  %v2029_v32 = vmov 0 }
  0x33   :  { %v2014_v15 = vsel %vm1546_vm11, 4294967295, %v2013_v15  ;;  %1218 = vmatpush3.bf16.msk.msra.mxu1 %vm1546_vm11, %v1461_v17  ;;  %1290 = vmatpush3.bf16.msk.msra.mxu0 %vm1546_vm11, %v1461_v17  ;;  %vm1557_vm12 = vmand %vm70_vm6, %vm88_vm7  ;;  %vm74_vm6 = vcmp.ge.s32.totalorder %v55_v16, %v1516_v6  ;;  %vm92_vm7 = vcmp.lt.s32.totalorder %v55_v16, %v1521_v9  ;;  %vm77_vm0 = vcmp.ge.s32.totalorder %v58_v24, %v1516_v6 }
  0x34   :  { %1219 = vmatprep.subr.bf16.mxu1 %v1458_v1  ;;  %1291 = vmatprep.subr.bf16.mxu0 %v1458_v1  ;;  %vm1566_vm15 = vmand %vm71_vm9, %vm89_vm10  ;;  %vm75_vm10 = vcmp.ge.s32.totalorder %v56_v19, %v1516_v6  ;;  %v1630_v33 = vsub.f32 %v840_v26, %v840_v26  ;;  %v1632_v34 = vsub.f32 %v841_v27, %v841_v27  ;;  %v61_v37 = vadd.s32 96, %v1509_v2 }
  0x35   :  { %vm1576_vm3 = vmpackc.low %vm1566_vm15, %vm1557_vm12  ;;  %vm79_vm11 = vcmp.ge.s32.totalorder %v60_v31, %v1516_v6  ;;  %v62_v39 = vadd.s32 104, %v1509_v2  ;;  %v842_v45 = vsel %vm1557_vm12, 1.0, %v1460_v4  ;;  %v843_v47 = vsel %vm1566_vm15, 1.0, %v1460_v4 }
  0x36   :  { %v2020_v21 = vsel %vm1576_vm3, 4294967295, %v2019_v21  ;;  %vm1581_vm4 = vmand %vm72_vm13, %vm90_vm14  ;;  %vm93_vm13 = vcmp.lt.s32.totalorder %v56_v19, %v1521_v9  ;;  %v244_v43 = vand.u32 4294901760, %v1630_v33  ;;  %v251_v44 = vand.u32 4294901760, %v1632_v34 }
  0x37   :  { %1221 = vmatpush3.bf16.msk.msra.mxu1 %vm1576_vm3, %v1461_v17  ;;  %1293 = vmatpush3.bf16.msk.msra.mxu0 %vm1576_vm3, %v1461_v17  ;;  %vm1594_vm9 = vmand %vm73_vm1, %vm91_vm2  ;;  %vm95_vm3 = vcmp.lt.s32.totalorder %v58_v24, %v1521_v9  ;;  %v45_v49 = vsub.f32 %v43_v40, %v44_v41  ;;  %v63_v50 = vadd.s32 112, %v1509_v2  ;;  %v844_v51 = vsel %vm1581_vm4, 1.0, %v1460_v4 }
  0x38   :  { %1222 = vmatprep.subr.bf16.mxu1 %v1458_v1  ;;  %1294 = vmatprep.subr.bf16.mxu0 %v1458_v1  ;;  %vm1612_vm14 = vmpackc.low %vm1594_vm9, %vm1581_vm4  ;;  %v64_v53 = vadd.s32 120, %v1509_v2  ;;  %v1717_v55 = vsub.f32 %v842_v45, %v842_v45  ;;  %v1719_v56 = vsub.f32 %v843_v47, %v843_v47  ;;  %v245_v58 = vsub.f32 %v1630_v33, %v244_v43 }
  0x39   :  { %v2026_v28 = vsel %vm1612_vm14, 4294967295, %v2025_v28  ;;  %vm1617_vm1 = vmand %vm74_vm6, %vm92_vm7  ;;  %v46_v54 = vadd.f32 1e-06, %v45_v49  ;;  %v252_v59 = vsub.f32 %v1632_v34, %v251_v44  ;;  %v845_v60 = vsel %vm1594_vm9, 1.0, %v1460_v4 }
  0x3a   :  { %vm1624_vm2 = vmand %vm75_vm10, %vm93_vm13  ;;  %vm78_vm10 = vcmp.ge.s32.totalorder %v59_v29, %v1516_v6  ;;  %vm96_vm13 = vcmp.lt.s32.totalorder %v59_v29, %v1521_v9  ;;  %v1750_v63 = vsub.f32 %v844_v51, %v844_v51  ;;  %v846_v0 = vsel %vm1617_vm1, 1.0, %v1460_v4 }
  0x3b   :  { %v2030_v32 = vsel %vm1624_vm2, 4294967295, %v2029_v32  ;;  %1224 = vmatpush3.bf16.msk.msra.mxu1 %vm1612_vm14, %v1461_v17  ;;  %1296 = vmatpush3.bf16.msk.msra.mxu0 %vm1612_vm14, %v1461_v17  ;;  %vm1644_vm6 = vmpackc.low %vm1624_vm2, %vm1617_vm1  ;;  %vm97_vm2 = vcmp.lt.s32.totalorder %v60_v31, %v1521_v9  ;;  %v47_v62 = vmul.f32 %v46_v54, %v46_v54  ;;  %vm82_vm9 = vcmp.ge.s32.totalorder %v63_v50, %v1516_v6 }
  0x3c   :  { %1225 = vmatprep.subr.bf16.mxu1 %v1458_v1  ;;  %1297 = vmatprep.subr.bf16.mxu0 %v1458_v1  ;;  %vm1650_vm7 = vmand %vm76_vm5, %vm94_vm8  ;;  %vm98_vm8 = vcmp.lt.s32.totalorder %v61_v37, %v1521_v9  ;;  %v258_v7 = vand.u32 4294901760, %v1717_v55  ;;  %v265_v8 = vand.u32 4294901760, %v1719_v56  ;;  %v1766_v10 = vsub.f32 %v845_v60, %v845_v60 }
  0x3d   :  { %vm1657_vm14 = vmand %vm77_vm0, %vm95_vm3  ;;  %vm80_vm3 = vcmp.ge.s32.totalorder %v61_v37, %v1516_v6  ;;  %v1762_v5 = vand.u32 4294901760, %v47_v62  ;;  %v1782_v12 = vsub.f32 %v846_v0, %v846_v0  ;;  %v246_v16 = vand.u32 4294901760, %v245_v58 }
  0x3e   :  { %vm1668_vm5 = vmpackc.low %vm1657_vm14, %vm1650_vm7  ;;  %v253_v18 = vand.u32 4294901760, %v252_v59  ;;  %v272_v22 = vand.u32 4294901760, %v1750_v63  ;;  %v848_v23 = vsel %vm1650_vm7, 1.0, %v1460_v4  ;;  %v849_v24 = vsel %vm1657_vm14, 1.0, %v1460_v4 }
  0x3f   :  { %1227 = vmatpush3.bf16.msk.msra.mxu1 %vm1644_vm6, %v1461_v17  ;;  %1299 = vmatpush3.bf16.msk.msra.mxu0 %vm1644_vm6, %v1461_v17  ;;  %vm1685_vm0 = vmand %vm78_vm10, %vm96_vm13  ;;  %vm81_vm10 = vcmp.ge.s32.totalorder %v62_v39, %v1516_v6  ;;  %vm99_vm13 = vcmp.lt.s32.totalorder %v62_v39, %v1521_v9  ;;  %v1793_v14 = vsub.f32 %v47_v62, %v1762_v5  ;;  %v286_v27 = vand.u32 4294901760, %v1782_v12 }
  0x40   :  { %1228 = vmatprep.subr.bf16.mxu1 %v1458_v1  ;;  %1300 = vmatprep.subr.bf16.mxu0 %v1458_v1  ;;  %vm1696_vm12 = vmand %vm79_vm11, %vm97_vm2  ;;  %vm100_vm2 = vcmp.lt.s32.totalorder %v63_v50, %v1521_v9  ;;  %v266_v26 = vsub.f32 %v1719_v56, %v265_v8  ;;  %v1837_v36 = vsub.f32 %v849_v24, %v849_v24  ;;  %v850_v37 = vsel %vm1685_vm0, 1.0, %v1460_v4 }
  0x41   :  { %vm1712_vm11 = vmpackc.low %vm1696_vm12, %vm1685_vm0  ;;  %v233_v25 = vand.u32 4294901760, %v1793_v14  ;;  %v851_v38 = vsel %vm1696_vm12, 1.0, %v1460_v4  ;;  %v1241_v40 = vpack.c.bf16 %v253_v18, %v246_v16  ;;  %v273_v41 = vsub.f32 %v1750_v63, %v272_v22 }
  0x42   :  { %vm1727_vm15 = vmand %vm80_vm3, %vm98_vm8  ;;  %vm2049_vm3 = vnez %v2030_v32  ;;  %vm83_vm8 = vcmp.ge.s32.totalorder %v64_v53, %v1516_v6  ;;  %v259_v6 = vsub.f32 %v1717_v55, %v258_v7  ;;  %v1835_v32 = vsub.f32 %v848_v23, %v848_v23 }
  0x43   :  { %1230 = vmatpush3.bf16.msk.msra.mxu1 %vm1668_vm5, %v1461_v17  ;;  %1302 = vmatpush3.bf16.msk.msra.mxu0 %vm1668_vm5, %v1461_v17  ;;  %vm1746_vm4 = vmand %vm81_vm10, %vm99_vm13  ;;  %v847_v3 = vsel %vm2049_vm3, 1.0, %v1460_v4  ;;  %vm101_vm10 = vcmp.lt.s32.totalorder %v64_v53, %v1521_v9  ;;  %v279_v9 = vand.u32 4294901760, %v1766_v10  ;;  %v234_v30 = vsub.f32 %v1793_v14, %v233_v25 }
  0x44   :  { %1231 = vmatprep.subr.bf16.mxu1 %v1458_v1  ;;  %1303 = vmatprep.subr.bf16.mxu0 %v1458_v1  ;;  %vm1778_vm1 = vmpackc.low %vm1746_vm4, %vm1727_vm15  ;;  %v1795_v19 = vsub.f32 %v847_v3, %v847_v3  ;;  %v1313_v45 = vpack.c.bf16 %v251_v44, %v244_v43  ;;  %v260_v46 = vand.u32 4294901760, %v259_v6  ;;  %v267_v47 = vand.u32 4294901760, %v266_v26 }
  0x45   :  { %vm1788_vm13 = vmand %vm82_vm9, %vm100_vm2  ;;  %v235_v39 = vand.u32 4294901760, %v234_v30  ;;  %v280_v48 = vsub.f32 %v1766_v10, %v279_v9  ;;  %v300_v49 = vand.u32 4294901760, %v1835_v32  ;;  %v307_v50 = vand.u32 4294901760, %v1837_v36 }
  0x46   :  { %vm1801_vm3 = vmand %vm83_vm8, %vm101_vm10  ;;  %v293_v31 = vand.u32 4294901760, %v1795_v19  ;;  %v1861_v51 = vsub.f32 %v850_v37, %v850_v37  ;;  %v1863_v53 = vsub.f32 %v851_v38, %v851_v38  ;;  %v852_v43 = vsel %vm1727_vm15, 1.0, %v1460_v4 }
  0x47   :  { %1233 = vmatpush3.bf16.msk.msra.mxu1 %vm1712_vm11, %v1461_v17  ;;  %1305 = vmatpush3.bf16.msk.msra.mxu0 %vm1712_vm11, %v1461_v17  ;;  %vm1829_vm14 = vmpackc.low %vm1801_vm3, %vm1788_vm13  ;;  %v853_v44 = vsel %vm1746_vm4, 1.0, %v1460_v4  ;;  %v1316_v54 = vpack.c.bf16 %v265_v8, %v258_v7  ;;  %v274_v58 = vand.u32 4294901760, %v273_v41  ;;  %v1244_v59 = vpack.c.bf16 %v267_v47, %v260_v46 }
  0x48   :  { %1234 = vmatprep.subr.bf16.mxu1 %v1458_v1  ;;  %1306 = vmatprep.subr.bf16.mxu0 %v1458_v1  ;;  %v281_v60 = vand.u32 4294901760, %v280_v48  ;;  %v287_v62 = vsub.f32 %v1782_v12, %v286_v27  ;;  %v294_v0 = vsub.f32 %v1795_v19, %v293_v31  ;;  %v314_v57 = vand.u32 4294901760, %v1861_v51 }
  0x49   :  { %v321_v61 = vand.u32 4294901760, %v1863_v53  ;;  %v1877_v3 = vsub.f32 %v852_v43, %v852_v43  ;;  %v1879_v7 = vsub.f32 %v853_v44, %v853_v44  ;;  %vm2058_vm7 = vmmov 0  }
  0x4a   :  { %v854_v8 = vsel %vm1788_vm13, 1.0, %v1460_v4  ;;  %v855_v16 = vsel %vm1801_vm3, 1.0, %v1460_v4  ;;  %v1319_v18 = vpack.c.bf16 %v279_v9, %v272_v22  ;;  %v301_v23 = vsub.f32 %v1835_v32, %v300_v49 }
  0x4b   :  { %1236 = vmatpush3.bf16.msk.msra.mxu1 %vm1778_vm1, %v1461_v17  ;;  %1308 = vmatpush3.bf16.msk.msra.mxu0 %vm1778_vm1, %v1461_v17  ;;  %v1247_v24 = vpack.c.bf16 %v281_v60, %v274_v58  ;;  %v295_v6 = vand.u32 4294901760, %v294_v0  ;;  %v308_v26 = vsub.f32 %v1837_v36, %v307_v50  ;;  %v328_v13 = vand.u32 4294901760, %v1877_v3 }
  0x4c   :  { %1237 = vmatprep.subr.bf16.mxu1 %v1458_v1  ;;  %1309 = vmatprep.subr.bf16.mxu0 %v1458_v1  ;;  %v335_v30 = vand.u32 4294901760, %v1879_v7  ;;  %v1897_v20 = vsub.f32 %v854_v8, %v854_v8  ;;  %v1899_v22 = vsub.f32 %v855_v16, %v855_v16  ;;  %v1322_v9 = vpack.c.bf16 %v293_v31, %v286_v27 }
  0x4d   :  { %v302_v37 = vand.u32 4294901760, %v301_v23  ;;  %v322_v41 = vsub.f32 %v1863_v53, %v321_v61  ;;  %v1325_v47 = vpack.c.bf16 %v307_v50, %v300_v49  ;;  %v329_v27 = vsub.f32 %v1877_v3, %v328_v13 }
  0x4e   :  { %v349_v46 = vand.u32 4294901760, %v1899_v22  ;;  %v336_v44 = vsub.f32 %v1879_v7, %v335_v30  ;;  %v1331_v0 = vpack.c.bf16 %v335_v30, %v328_v13  ;;  %vm2059_vm0 = vnez %v2014_v15 }
  0x4f   :  { %1239 = vmatpush3.bf16.msk.msra.mxu1 %vm1829_vm14, %v1461_v17  ;;  %1311 = vmatpush3.bf16.msk.msra.mxu0 %vm1829_vm14, %v1461_v17  ;;  %v323_v43 = vand.u32 4294901760, %v322_v41  ;;  %v330_v58 = vand.u32 4294901760, %v329_v27  ;;  %v1268_v23 = vpack.c.bf16 %v1719_v56, %v1717_v55  ;;  %vm2060_vm12 = vnez %v2020_v21 }
  0x50   :  { %1240 = vmatprep.subr.bf16.mxu1 %v1458_v1  ;;  %1312 = vmatprep.subr.bf16.mxu0 %v1458_v1  ;;  %v337_v60 = vand.u32 4294901760, %v336_v44  ;;  %v350_v50 = vsub.f32 %v1899_v22, %v349_v46  ;;  %v1271_v15 = vpack.c.bf16 %v1766_v10, %v1750_v63  ;;  %vm2061_vm15 = vnez %v2026_v28 }
  0x51   :  { %v1277_v21 = vpack.c.bf16 %v1837_v36, %v1835_v32  ;;  %v1280_v28 = vpack.c.bf16 %v1863_v53, %v1861_v51  ;;  %vm811_vm4 = vcmask 31744  }
  0x52   :  { %1039 = vmatmul.mubr.f32.vlgmr.msra.gmra.mrb[0].mxu1 %v235_v39  ;;  %1144 = vmatmul.mubr.f32.vlgmr.msra.gmra.mrb[0].mxu0 %v233_v25  ;;  %v288_v25 = vand.u32 4294901760, %v287_v62  ;;  %v309_v39 = vand.u32 4294901760, %v308_v26  ;;  %v1259_v62 = vpack.c.bf16 %v337_v60, %v330_v58  ;;  %v351_v16 = vand.u32 4294901760, %v350_v50 }
  0x53   :  { %1242 = vmatpush3.bf16.msra.mxu1 %v1241_v40  ;;  %1314 = vmatpush3.bf16.msra.mxu0 %v1313_v45  ;;  %v315_v40 = vsub.f32 %v1861_v51, %v314_v57  ;;  %v342_v45 = vand.u32 4294901760, %v1897_v20 }
  0x54   :  { %1243 = vmatprep.subr.bf16.mxu1 %v1458_v1  ;;  %1315 = vmatprep.subr.bf16.mxu0 %v1458_v1  ;;  %v1250_v38 = vpack.c.bf16 %v295_v6, %v288_v25  ;;  %v1253_v31 = vpack.c.bf16 %v309_v39, %v302_v37 }
  0x55   :  { %1073 = vmatprep.mubr.msk.f32.mxu1 %vm2058_vm7, %v1460_v4  ;;  %1178 = vmatprep.mubr.msk.f32.mxu0 %vm2058_vm7, %v1460_v4  ;;  %v316_v48 = vand.u32 4294901760, %v315_v40  ;;  %v343_v49 = vsub.f32 %v1897_v20, %v342_v45 }
  0x57   :  { %1245 = vmatpush3.bf16.msra.mxu1 %v1244_v59  ;;  %1317 = vmatpush3.bf16.msra.mxu0 %v1316_v54  ;;  %v1328_v54 = vpack.c.bf16 %v321_v61, %v314_v57  ;;  %v1256_v59 = vpack.c.bf16 %v323_v43, %v316_v48  ;;  %v344_v8 = vand.u32 4294901760, %v343_v49  ;;  %v1334_v61 = vpack.c.bf16 %v349_v46, %v342_v45 }
  0x58   :  { %1246 = vmatprep.subr.bf16.mxu1 %v1458_v1  ;;  %1318 = vmatprep.subr.bf16.mxu0 %v1458_v1 }
  0x59   :  { %v1262_v57 = vpack.c.bf16 %v351_v16, %v344_v8 }
  0x5b   :  { %1248 = vmatpush3.bf16.msra.mxu1 %v1247_v24  ;;  %1320 = vmatpush3.bf16.msra.mxu0 %v1319_v18  ;;  %v1265_v18 = vpack.c.bf16 %v1632_v34, %v1630_v33  ;;  %v1283_v33 = vpack.c.bf16 %v1879_v7, %v1877_v3  ;;  %v1286_v34 = vpack.c.bf16 %v1899_v22, %v1897_v20 }
  0x5c   :  { %1249 = vmatprep.subr.bf16.mxu1 %v1458_v1  ;;  %1321 = vmatprep.subr.bf16.mxu0 %v1458_v1 }
  0x5f   :  { %1251 = vmatpush3.bf16.msra.mxu1 %v1250_v38  ;;  %1323 = vmatpush3.bf16.msra.mxu0 %v1322_v9 }
  0x60   :  { %1252 = vmatprep.subr.bf16.mxu1 %v1458_v1  ;;  %1324 = vmatprep.subr.bf16.mxu0 %v1458_v1 }
  0x63   :  { %1254 = vmatpush3.bf16.msra.mxu1 %v1253_v31  ;;  %1326 = vmatpush3.bf16.msra.mxu0 %v1325_v47 }
  0x64   :  { %1255 = vmatprep.subr.bf16.mxu1 %v1458_v1  ;;  %1327 = vmatprep.subr.bf16.mxu0 %v1458_v1 }
  0x67   :  { %1257 = vmatpush3.bf16.msra.mxu1 %v1256_v59  ;;  %1329 = vmatpush3.bf16.msra.mxu0 %v1328_v54 }
  0x68   :  { %1258 = vmatprep.subr.bf16.mxu1 %v1458_v1  ;;  %1330 = vmatprep.subr.bf16.mxu0 %v1458_v1 }
  0x6b   :  { %1260 = vmatpush3.bf16.msra.mxu1 %v1259_v62  ;;  %1332 = vmatpush3.bf16.msra.mxu0 %v1331_v0 }
  0x6c   :  { %1261 = vmatprep.subr.bf16.mxu1 %v1458_v1  ;;  %1333 = vmatprep.subr.bf16.mxu0 %v1458_v1 }
  0x6f   :  { %1263 = vmatpush3.bf16.msra.mxu1 %v1262_v57  ;;  %1335 = vmatpush3.bf16.msra.mxu0 %v1334_v61 }
  0x70   :  { %1264 = vmatprep.subr.bf16.mxu1 %v1458_v1  ;;  %1336 = vmatprep.subr.bf16.mxu0 %v1458_v1 }
  0x72   :  { %1074 = vmatmul.mubr.f32.vlgmr.msra.gmra.mrb[0].mxu1 %v1762_v5  ;;  %1179 = vmatmul.mubr.f32.vlgmr.msra.gmra.mrb[0].mxu0 %v1762_v5 }
  0x73   :  { %1266 = vmatpush3.bf16.msra.mxu1 %v1265_v18  ;;  %1338 = vmatpush3.bf16.msk.msra.mxu0 %vm2059_vm0, %v1461_v17 }
  0x74   :  { %1267 = vmatprep.subr.bf16.mxu1 %v1458_v1  ;;  %1339 = vmatprep.subr.bf16.mxu0 %v1458_v1 }
  0x75   :  { %1108 = vmatprep.mubr.msk.f32.mxu1 %vm2058_vm7, %v1460_v4  ;;  %1213 = vmatprep.mubr.msk.f32.mxu0 %vm2058_vm7, %v1460_v4  ;;  %v1274_v4 = vpack.c.bf16 %v1795_v19, %v1782_v12 }
  0x77   :  { %1269 = vmatpush3.bf16.msra.mxu1 %v1268_v23  ;;  %1341 = vmatpush3.bf16.msk.msra.mxu0 %vm2060_vm12, %v1461_v17 }
  0x78   :  { %1270 = vmatprep.subr.bf16.mxu1 %v1458_v1  ;;  %1342 = vmatprep.subr.bf16.mxu0 %v1458_v1 }
  0x7b   :  { %1272 = vmatpush3.bf16.msra.mxu1 %v1271_v15  ;;  %1344 = vmatpush3.bf16.msk.msra.mxu0 %vm2061_vm15, %v1461_v17 }
  0x7c   :  { %1273 = vmatprep.subr.bf16.mxu1 %v1458_v1  ;;  %1345 = vmatprep.subr.bf16.mxu0 %v1458_v1 }
  0x7f   :  { %1275 = vmatpush3.bf16.msra.mxu1 %v1274_v4  ;;  %1347 = vmatpush3.bf16.msk.msra.mxu0 %vm1644_vm6, %v1461_v17 }
  0x80   :  { %1276 = vmatprep.subr.bf16.mxu1 %v1458_v1  ;;  %1348 = vmatprep.subr.bf16.mxu0 %v1458_v1 }
  0x83   :  { %1278 = vmatpush3.bf16.msra.mxu1 %v1277_v21  ;;  %1350 = vmatpush3.bf16.msk.msra.mxu0 %vm1668_vm5, %v1461_v17 }
  0x84   :  { %1279 = vmatprep.subr.bf16.mxu1 %v1458_v1  ;;  %1351 = vmatprep.subr.bf16.mxu0 %v1458_v1 }
  0x87   :  { %1281 = vmatpush3.bf16.msra.mxu1 %v1280_v28  ;;  %1353 = vmatpush3.bf16.msk.msra.mxu0 %vm1712_vm11, %v1461_v17  ;;  %vm809_vm11 = vcmp.lt.s32.totalorder %v1509_v2, 3 }
  0x88   :  { %1282 = vmatprep.subr.bf16.mxu1 %v1458_v1  ;;  %1354 = vmatprep.subr.bf16.mxu0 %v1458_v1 }
  0x8b   :  { %1284 = vmatpush3.bf16.msra.mxu1 %v1283_v33  ;;  %1356 = vmatpush3.bf16.msk.msra.mxu0 %vm1778_vm1, %v1461_v17 }
  0x8c   :  { %1285 = vmatprep.subr.bf16.mxu1 %v1458_v1  ;;  %1357 = vmatprep.subr.bf16.mxu0 %v1458_v1 }
  0x8f   :  { %1287 = vmatpush3.bf16.msra.mxu1 %v1286_v34  ;;  %1359 = vmatpush3.bf16.msk.msra.mxu0 %vm1829_vm14, %v1461_v17  ;;  %v798_v17 = vld [vmem:[%s2001_s2] sm:$0xff]  ;;  %s1462_s2 = smov [#allocation7]  }
  0x90   :  { %s830_s13 = sshll.u32 %s1462_s2, 4  ;;  %s831_s13 = int_to_ptr.vmem [resolvable:$true] %s830_s13 }
  0x91   :  { %s1426_s15 = scalar_lea.vmem %s831_s13, 128  ;;  %p1431_p3 = scmp.lt.s32.totalorder %s831_s13, %s831_s13 }
  0x92   :  { %1109 = vmatmul.mubr.f32.vlgmr.msra.gmra.mrb[0].mxu1 %v1793_v14  ;;  %1214 = vmatmul.mubr.f32.vlgmr.msra.gmra.mrb[0].mxu0 %v1762_v5  ;;  %v801_v5 = vsub.f32 1.0, %v798_v17  ;;  %p1427_p2 = scmp.ne.s32.totalorder %s831_s13, %s1426_s15  ;;  %p1432_p4 = scmp.lt.s32.totalorder %s1426_s15, %s1426_s15 }
  0x94   :  { %p1433_p5 = por %p1432_p4, %p1431_p3 }
  0x96   :  { %p1434_p6 = pnand %p1433_p5, %p1427_p2 }
 0x165   :  { %v492_v35 = vpop.f32.mrb[0].mxu1  ;;  %v787_v42 = vpop.f32.mrb[0].mxu0 }
 0x166   :  { %v1360_v52 = vadd.f32 %v787_v42, %v492_v35  ;;  %v1110_v55 = vpop.f32.mrb[1].mxu1  ;;  %v1215_v56 = vpop.f32.mrb[1].mxu0 }
 0x168   :  { %1380 = vrsqrt.f32 %v1360_v52  ;;  %vm793_vm6 = vcmp.eq.f32.partialorder %v1360_v52, inf  ;;  %v796_v11 = vand.u32 2147483648, %v1360_v52  ;;  %vm795_vm5 = vcmp.eq.f32.partialorder %v1360_v52, 0.0 }
 0x169   :  { %v802_v32 = vmul.f32 %v1360_v52, %v801_v5 }
 0x172   :  { %v1381_v63 = vpop.eup %1380 }
 0x173   :  { %v792_v10 = vmul.f32 %v1381_v63, %v1360_v52 }
 0x175   :  { %v794_v1 = vsel %vm793_vm6, %v1360_v52, %v792_v10 }
 0x176   :  { %v797_v12 = vsel %vm795_vm5, %v796_v11, %v794_v1 }
 0x177   :  { %v799_v14 = vsub.f32 1.0, %v797_v12 }
 0x179   :  { %v800_v19 = vmax.f32 %v799_v14, 0.0 }
 0x17b   :  { %v803_v29 = vmul.f32 %v800_v19, %v800_v19 }
 0x17d   :  { %v804_v36 = vmul.f32 %v803_v29, %v798_v17 }
 0x17f   :  { %v805_v51 = vadd.f32 %v804_v36, %v802_v32 }
 0x181   :  { %v810_v53 = vsel %vm809_vm11, %v805_v51, 0.0 }
 0x182   :  { %v812_v3 = vsel %vm811_vm4, %v810_v53, 0.0 }
 0x183   :  { %813 = vadd.xlane.f32.xlu0 %v812_v3 }
 0x210   :  { %v814_v7 = vpop.xlane.xlu0 %813 }
 0x211   :  { %v815_v24 = vrot.slane %v814_v7, 4 }
 0x213   :  { %v816_v25 = vadd.f32 %v815_v24, %v814_v7 }
 0x215   :  { %v817_v6 = vrot.slane %v816_v25, 2 }
 0x217   :  { %v818_v26 = vadd.f32 %v817_v6, %v816_v25 }
 0x219   :  { %v819_v13 = vrot.slane %v818_v26, 1 }
 0x21b   :  { %v820_v30 = vadd.f32 %v819_v13, %v818_v26 }
 0x21d   :  { %1369 = vpush %v820_v30 }
 0x24e   :  { %s1370_s14 = spop %1369 }
 0x24f   :  { %v822_v20 = vstv %s1370_s14 }
 0x250   :  { %823 = vst [vmem:[#allocation7] sm:$0xff] %v822_v20 }
 0x251   :  { %1437 = shalt.err (!%p1434_p6)
}
 0x252   :  { %s1438_s18 = scalar_lea.hbm %s2002_s3, 128 }
 0x253   :  { %p1439_p7 = scmp.ne.s32.totalorder %s2002_s3, %s1438_s18  ;;  %p1442_p8 = scmp.lt.u32.totalorder %s1438_s18, %s2002_s3 }
 0x255   :  { %p1444_p9 = pnand %p1442_p8, %p1439_p7 }
 0x257   :  { %1447 = shalt.err (!%p1444_p9)
}
 0x258   :  { %833 = dma.vmem_to_hbm [thread:$0]  %s831_s13, 128, %s2002_s3, [#allocation4]  }
 0x259   :  { %1452 = dma.done.wait [#allocation4], 128  }
 0x25a   :  { %1453 = vsyncadd [#allocation4], 4294967168 }
 0x25b   :  { %837 = vsyncpa [#allocation3], 1 }
 0x25c   :  { %838 = vsyncpa [#allocation6], 1 }
 0x25d   :  { %839 = vsyncpa [#allocation4], 1 }

</bundles_post_ra>
